<compile_context>
chip_gen: v5e
topology: v5e:2x2
jax: 0.10.0
libtpu: 0.0.40
codegen_flags: <defaults>
</compile_context>

<pallas_src>
import jax
import jax.numpy as jnp
from jax.experimental import pallas as pl
from jax.experimental.pallas import tpu as pltpu


def _round_up(a, b):
    return ((a + b - 1) // b) * b


def _fcn_kernel(x_ref, w_ref, s_ref, b_ref, o_ref):
    # x_ref: (tm, Kp) input dtype; w_ref: (Kp, Cp) bf16 block-diag weight;
    # s_ref / b_ref: (1, Cp) f32 BN scale / folded bias; o_ref: (tm, Cp) bf16.
    x = x_ref[...].astype(jnp.bfloat16)          # free VPU cast, hidden by DMA
    acc = jnp.dot(x, w_ref[...], preferred_element_type=jnp.float32)
    y = jnp.maximum(acc * s_ref[...] + b_ref[...], 0.0)
    o_ref[...] = y.astype(o_ref.dtype)


def make_fcn(weight, lin_bias, gamma, beta, run_mean, run_var, eps=1e-5,
             tm_max=2048):
    """One-time param prep (BN fold, block-diag packing); returns jitted apply.

    weight: (cout, cin) PyTorch nn.Linear layout. Output is bf16; upcast in
    the consumer only if it truly needs f32.
    """
    # TODO(synk): training-mode BatchNorm (batch statistics + running-stat
    # updates) not implemented; eval-mode running-stat semantics only.
    cout, cin = weight.shape

    # Lane-packing factor: pack `pack` consecutive rows of x into one packed
    # row so the output width pack*cout approaches 128 lanes of real data.
    pack = max(1, 128 // cout) if cout < 128 else 1
    Kp = pack * cin
    Cp = pack * cout

    inv_std = 1.0 / jnp.sqrt(run_var.astype(jnp.float32) + eps)
    scale = gamma.astype(jnp.float32) * inv_std                      # (cout,)
    bias = beta.astype(jnp.float32) + (
        lin_bias.astype(jnp.float32) - run_mean.astype(jnp.float32)) * scale

    w2d = weight.T.astype(jnp.float32)                               # (cin, cout)
    # blockdiag(W, ..., W): packed row [r0|r1|...|r_{p-1}] @ Wp = [r0W|r1W|...]
    w_packed = jnp.kron(jnp.eye(pack, dtype=jnp.float32), w2d)       # (Kp, Cp)
    w_packed = w_packed.astype(jnp.bfloat16)
    scale_p = jnp.tile(scale, pack).reshape(1, Cp)
    bias_p = jnp.tile(bias, pack).reshape(1, Cp)

    def apply(x):
        kk, t, cin_x = x.shape
        assert cin_x == cin
        M = kk * t

        m_align = 16                      # bf16 output packs 16 rows per vreg
        mp = _round_up(pl.cdiv(M, pack), m_align)     # packed rows
        grid_m = max(1, pl.cdiv(mp, tm_max))
        if grid_m == 1 and mp >= 2 * m_align:
            grid_m = 2                    # give both v7x TensorCores work
        tm = _round_up(pl.cdiv(mp, grid_m), m_align)
        mp = grid_m * tm

        x2d = x.reshape(M, cin)
        if mp * pack > M:                 # ragged last tile only; zeros pad
            x2d = jnp.pad(x2d, ((0, mp * pack - M), (0, 0)))
        xp = x2d.reshape(mp, Kp)          # contiguous reshape, no data move

        cost = pl.CostEstimate(
            flops=2 * mp * Kp * Cp,
            transcendentals=0,
            bytes_accessed=(mp * Kp * x.dtype.itemsize + Kp * Cp * 2
                            + 2 * Cp * 4 + mp * Cp * 2),
        )

        out = pl.pallas_call(
            _fcn_kernel,
            out_shape=jax.ShapeDtypeStruct((mp, Cp), jnp.bfloat16),
            grid_spec=pltpu.PrefetchScalarGridSpec(
                num_scalar_prefetch=0,
                grid=(grid_m,),
                in_specs=[
                    pl.BlockSpec((tm, Kp), lambda i: (i, 0)),
                    pl.BlockSpec((Kp, Cp), lambda i: (0, 0)),
                    pl.BlockSpec((1, Cp), lambda i: (0, 0)),
                    pl.BlockSpec((1, Cp), lambda i: (0, 0)),
                ],
                out_specs=pl.BlockSpec((tm, Cp), lambda i: (i, 0)),
            ),
            compiler_params=pltpu.CompilerParams(
                dimension_semantics=("parallel",)),
            cost_estimate=cost,
        )(xp, w_packed, scale_p, bias_p)

        # Packed output unrolls contiguously back to (M, cout); padded rows
        # (ReLU(bias), not zero) are sliced off only if padding was needed.
        y = out.reshape(mp * pack, cout)
        if mp * pack > M:
            y = y[:M]
        return y.reshape(kk, t, cout)     # bf16; upcast downstream if needed

    return jax.jit(apply)


def _reference(x, weight, lin_bias, gamma, beta, run_mean, run_var, eps=1e-5):
    kk, t, cin = x.shape
    y = x.reshape(kk * t, cin) @ weight.T + lin_bias
    inv = 1.0 / jnp.sqrt(run_var + eps)
    y = (y - run_mean) * (gamma * inv) + beta
    return jnp.maximum(y, 0.0).reshape(kk, t, -1)


if __name__ == "__main__":
    kk, t, cin, cout = 48, 16, 16, 32

    key = jax.random.PRNGKey(0)
    kx, kw, kb, kg, kbe, km, kv = jax.random.split(key, 7)

    x = jax.random.normal(kx, (kk, t, cin), dtype=jnp.float32)
    weight = 0.1 * jax.random.normal(kw, (cout, cin), dtype=jnp.float32)
    lin_bias = 0.1 * jax.random.normal(kb, (cout,), dtype=jnp.float32)
    gamma = 1.0 + 0.1 * jax.random.normal(kg, (cout,), dtype=jnp.float32)
    beta = 0.1 * jax.random.normal(kbe, (cout,), dtype=jnp.float32)
    run_mean = 0.1 * jax.random.normal(km, (cout,), dtype=jnp.float32)
    run_var = jnp.abs(jax.random.normal(kv, (cout,), dtype=jnp.float32)) + 0.5

    fcn = make_fcn(weight, lin_bias, gamma, beta, run_mean, run_var)
    out = jax.block_until_ready(fcn(x))

    ref = _reference(x, weight, lin_bias, gamma, beta, run_mean, run_var)
    assert out.shape == ref.shape, (out.shape, ref.shape)
    out_f32 = out.astype(jnp.float32)
    max_err = float(jnp.max(jnp.abs(out_f32 - ref)))
    # bf16 operands + bf16 output (f32 accumulation) -> loosened tolerance.
    assert jnp.allclose(out_f32, ref, atol=3e-2, rtol=3e-2), max_err

    print("KERNEL_OK")
</pallas_src>

<mosaic_0001>
module attributes {stable_mosaic.version = 11 : i64} {
  func.func @_fcn_kernel(%arg0: i32, %arg1: memref<96x64xf32, #tpu.memory_space<vmem>>, %arg2: memref<64x128xbf16, #tpu.memory_space<vmem>>, %arg3: memref<1x128xf32, #tpu.memory_space<vmem>>, %arg4: memref<1x128xf32, #tpu.memory_space<vmem>>, %arg5: memref<96x128xbf16, #tpu.memory_space<vmem>>) attributes {dimension_semantics = [#tpu.dimension_semantics<parallel>], iteration_bounds = array<i64: 2>, scalar_prefetch = 0 : i64, scratch_operands = 0 : i64, tpu.core_type = #tpu.core_type<tc>, window_params = [{transform_indices = @transform_0, window_bounds = array<i64: 96, 64>}, {pipeline_mode = #tpu.pipeline_mode<synchronous>, transform_indices = @transform_1, window_bounds = array<i64: 64, 128>}, {pipeline_mode = #tpu.pipeline_mode<synchronous>, transform_indices = @transform_2, window_bounds = array<i64: 1, 128>}, {pipeline_mode = #tpu.pipeline_mode<synchronous>, transform_indices = @transform_3, window_bounds = array<i64: 1, 128>}, {transform_indices = @transform_4, window_bounds = array<i64: 96, 128>}]} {
    %c0 = arith.constant 0 : index
    %c0_0 = arith.constant 0 : index
    %0 = vector.load %arg1[%c0, %c0_0] : memref<96x64xf32, #tpu.memory_space<vmem>>, vector<96x64xf32>
    %1 = arith.truncf %0 : vector<96x64xf32> to vector<96x64xbf16>
    %c0_1 = arith.constant 0 : index
    %c0_2 = arith.constant 0 : index
    %2 = vector.load %arg2[%c0_1, %c0_2] : memref<64x128xbf16, #tpu.memory_space<vmem>>, vector<64x128xbf16>
    %cst = arith.constant dense<0.000000e+00> : vector<96x128xf32>
    %3 = tpu.matmul %1, %2, %cst {dimension_numbers = #tpu.dot_dimension_numbers<[1], [0], [0], [1], [0, 0, 1, 1], [], []>} : vector<96x64xbf16>, vector<64x128xbf16>, vector<96x128xf32> -> vector<96x128xf32>
    %c0_3 = arith.constant 0 : index
    %c0_4 = arith.constant 0 : index
    %4 = vector.load %arg3[%c0_3, %c0_4] : memref<1x128xf32, #tpu.memory_space<vmem>>, vector<1x128xf32>
    %5 = vector.broadcast %4 : vector<1x128xf32> to vector<96x128xf32>
    %6 = arith.mulf %3, %5 : vector<96x128xf32>
    %c0_5 = arith.constant 0 : index
    %c0_6 = arith.constant 0 : index
    %7 = vector.load %arg4[%c0_5, %c0_6] : memref<1x128xf32, #tpu.memory_space<vmem>>, vector<1x128xf32>
    %8 = vector.broadcast %7 : vector<1x128xf32> to vector<96x128xf32>
    %9 = arith.addf %6, %8 : vector<96x128xf32>
    %cst_7 = arith.constant 0.000000e+00 : f32
    %10 = vector.broadcast %cst_7 : f32 to vector<96x128xf32>
    %11 = arith.maximumf %9, %10 : vector<96x128xf32>
    %12 = arith.truncf %11 : vector<96x128xf32> to vector<96x128xbf16>
    %c0_8 = arith.constant 0 : index
    %c0_9 = arith.constant 0 : index
    %13 = vector.load %arg5[%c0_8, %c0_9] : memref<96x128xbf16, #tpu.memory_space<vmem>>, vector<96x128xbf16>
    tpu.vector_store %arg5[%c0_8, %c0_9], %12 {strides = array<i32>} : memref<96x128xbf16, #tpu.memory_space<vmem>>, vector<96x128xbf16>,
    return
  }
  func.func @transform_0(%arg0: i32) -> (i32, i32) {
    %c0_i32 = arith.constant 0 : i32
    %c0_i32_0 = arith.constant 0 : i32
    return %arg0, %c0_i32 : i32, i32
  }
  func.func @transform_1(%arg0: i32) -> (i32, i32) {
    %c0_i32 = arith.constant 0 : i32
    %c0_i32_0 = arith.constant 0 : i32
    %c0_i32_1 = arith.constant 0 : i32
    return %c0_i32, %c0_i32_0 : i32, i32
  }
  func.func @transform_2(%arg0: i32) -> (i32, i32) {
    %c0_i32 = arith.constant 0 : i32
    %c0_i32_0 = arith.constant 0 : i32
    %c0_i32_1 = arith.constant 0 : i32
    return %c0_i32, %c0_i32_0 : i32, i32
  }
  func.func @transform_3(%arg0: i32) -> (i32, i32) {
    %c0_i32 = arith.constant 0 : i32
    %c0_i32_0 = arith.constant 0 : i32
    %c0_i32_1 = arith.constant 0 : i32
    return %c0_i32, %c0_i32_0 : i32, i32
  }
  func.func @transform_4(%arg0: i32) -> (i32, i32) {
    %c0_i32 = arith.constant 0 : i32
    %c0_i32_0 = arith.constant 0 : i32
    return %arg0, %c0_i32 : i32, i32
  }
}

</mosaic_0001>

<bundles_post_ra>
// kernel: apply.1
= control target key start
LH: loop header
LB: loop body
LE: loop exit
PB: predicated region body
PF: predicated region fallthrough
CT: control target
= control target key end

     0   :  { %s559_s15 = smov 0   ;;  %s626_s0 = inlined_call_operand.vmem [shape: f32[192,64], index: 0, kind: input, shape index: {}]   ;;  %s627_s1 = inlined_call_operand.vmem [shape: bf16[64,128], index: 1, kind: input, shape index: {}]   ;;  %s628_s2 = inlined_call_operand.vmem [shape: f32[1,128], index: 2, kind: input, shape index: {}]   ;;  %s629_s3 = inlined_call_operand.vmem [shape: f32[1,128], index: 3, kind: input, shape index: {}]   ;;  %s630_s4 = inlined_call_operand.vmem [shape: bf16[192,128], index: 4, kind: output, shape index: {}]  }
   0x1 LB: > { %s434_s16 = sadd.s32 4294967295, %s532_s15   ;;  %p438_p0 = scmp.ge.s32.totalorder %s532_s15, 1  ;;  %s532_s15 = sphi %s559_s15, %s14_s15  }
   0x2   : > { %p163_p1 = scmp.lt.s32.totalorder %s532_s15, 3 }
   0x4   : > { %p164_p2 = pnand %p438_p0, %p163_p1 }
   0x5   : > { %s189_s19 = smul.u32 (!%p164_p2), 12, %s434_s16 }
   0x6   : > { %167 = sbr.rel (%p164_p2) target bundleno = 192 (0xc0), region = 36 }
   0x7   : > { %p190_p3 = scmp.lt.s32.totalorder (!%p164_p2), %s189_s19, 23 }
   0xb   : > { %v468_v0 = vld [vmem:[%s627_s1 + $0x18] sm:$0xff]  ;;  %v467_v1 = vld [vmem:[%s627_s1 + $0x10] sm:$0xff]  ;;  %s632_s19 = smov (!%p190_p3, %s189_s19), 23  ;;  %v466_v2 = vld [vmem:[%s627_s1 + $0x8] sm:$0xff]  ;;  %vm252_vm0 = vcmask 523264  }
   0xc   : > { %504 = vmatpush.bf16.msra.mxu1 %v468_v0  ;;  %506 = vmatpush.bf16.msra.mxu3 %v468_v0  ;;  %s439_s24 = sshll.u32 %s632_s19, 3  ;;  %v465_v3 = vld [vmem:[%s627_s1] sm:$0xff]  ;;  %s440_s8 = sshll.u32 %s632_s19, 2 }
   0xd   : > { %505 = vmatpush.bf16.msra.mxu2 %v468_v0  ;;  %275 = vmatpush.bf16.msra.mxu0 %v468_v0  ;;  %s582_s27 = scalar_lea.vmem %s626_s0, %s439_s24  ;;  %v524_v23 = vld [vmem:[%s628_s2] ss:$0 sm:$0xff]  ;;  %s615_s11 = scalar_lea.vmem %s630_s4, %s440_s8 }
   0xe   : > { %v204_v4 = vld [vmem:[%s582_s27 + $0x10] sm:$0xff]  ;;  %v205_v5 = vld [vmem:[%s582_s27 + $0x18] sm:$0xff]  ;;  %v210_v6 = vld [vmem:[%s582_s27 + $0x40] sm:$0xff] }
   0xf   : > { %v211_v7 = vld [vmem:[%s582_s27 + $0x48] sm:$0xff]  ;;  %v208_v8 = vld [vmem:[%s582_s27 + $0x30] sm:$0xff]  ;;  %v209_v9 = vld [vmem:[%s582_s27 + $0x38] sm:$0xff]  ;;  %v215_v12 = vpack.c.bf16 %v205_v5, %v204_v4 }
  0x10   : > { %507 = vmatpush.bf16.msra.mxu1 %v467_v1  ;;  %509 = vmatpush.bf16.msra.mxu3 %v467_v1  ;;  %v202_v10 = vld [vmem:[%s582_s27] sm:$0xff]  ;;  %v203_v11 = vld [vmem:[%s582_s27 + $0x8] sm:$0xff]  ;;  %v218_v13 = vpack.c.bf16 %v211_v7, %v210_v6  ;;  %v217_v14 = vpack.c.bf16 %v209_v9, %v208_v8  ;;  %v212_v18 = vld [vmem:[%s582_s27 + $0x50] sm:$0xff] }
  0x11   : > { %508 = vmatpush.bf16.msra.mxu2 %v467_v1  ;;  %276 = vmatpush.bf16.msra.mxu0 %v467_v1  ;;  %v214_v15 = vpack.c.bf16 %v203_v11, %v202_v10  ;;  %v206_v16 = vld [vmem:[%s582_s27 + $0x20] sm:$0xff]  ;;  %v207_v17 = vld [vmem:[%s582_s27 + $0x28] sm:$0xff]  ;;  %v213_v19 = vld [vmem:[%s582_s27 + $0x58] sm:$0xff] }
  0x12   : > { %v216_v20 = vpack.c.bf16 %v207_v17, %v206_v16  ;;  %v219_v21 = vpack.c.bf16 %v213_v19, %v212_v18  ;;  %v525_v27 = vld [vmem:[%s629_s3] ss:$0 sm:$0xff] }
  0x14   : > { %510 = vmatpush.bf16.msra.mxu1 %v466_v2  ;;  %512 = vmatpush.bf16.msra.mxu3 %v466_v2 }
  0x15   : > { %511 = vmatpush.bf16.msra.mxu2 %v466_v2  ;;  %277 = vmatpush.bf16.msra.mxu0 %v466_v2 }
  0x18   : > { %513 = vmatpush.bf16.msra.mxu1 %v465_v3  ;;  %515 = vmatpush.bf16.msra.mxu3 %v465_v3 }
  0x19   : > { %514 = vmatpush.bf16.msra.mxu2 %v465_v3  ;;  %278 = vmatpush.bf16.msra.mxu0 %v465_v3 }
  0x1b   : > { %458 = vmatmul.msk.bf16.vlgmr.msra.gmra.mxu1 %vm252_vm0, %v215_v12  ;;  %461 = vmatmul.msk.bf16.vlgmr.msra.gmra.mxu3 %vm252_vm0, %v218_v13 }
  0x1c   : > { %460 = vmatmul.msk.bf16.vlgmr.msra.gmra.mxu2 %vm252_vm0, %v217_v14  ;;  %457 = vmatmul.msk.bf16.vlgmr.msra.gmra.mxu0 %vm252_vm0, %v214_v15 }
  0x2b   : > { %459 = vmatmul.msk.bf16.gmra.mxu1 %vm252_vm0, %v216_v20  ;;  %462 = vmatmul.msk.bf16.gmra.mxu3 %vm252_vm0, %v219_v21 }
  0x98   : > { %v285_v22 = vpop.f32.mrf.mxu1 }
  0x99   : > { %v280_v24 = vpop.f32.mrf.mxu0  ;;  %v316_v26 = vmul.f32 %v524_v23, %v285_v22 }
  0x9a   : > { %v314_v25 = vmul.f32 %v524_v23, %v280_v24 }
  0x9b   : > { %v332_v32 = vadd.f32 %v525_v27, %v316_v26 }
  0x9c   : > { %v330_v31 = vadd.f32 %v525_v27, %v314_v25 }
  0x9d   : > { %v344_v41 = vmax.f32 %v332_v32, 0.0 }
  0x9e   : > { %v300_v28 = vpop.f32.mrf.mxu3  ;;  %v342_v39 = vmax.f32 %v330_v31, 0.0 }
  0x9f   : > { %v295_v29 = vpop.f32.mrf.mxu2  ;;  %v322_v37 = vmul.f32 %v524_v23, %v300_v28 }
  0xa0   : > { %v287_v30 = vpop.f32.mrf.mxu1  ;;  %v320_v35 = vmul.f32 %v524_v23, %v295_v29 }
  0xa1   : > { %v317_v33 = vmul.f32 %v524_v23, %v287_v30  ;;  %v282_v34 = vpop.f32.mrf.mxu0  ;;  %v338_v46 = vadd.f32 %v525_v27, %v322_v37 }
  0xa2   : > { %v315_v36 = vmul.f32 %v524_v23, %v282_v34  ;;  %v336_v43 = vadd.f32 %v525_v27, %v320_v35 }
  0xa3   : > { %v333_v38 = vadd.f32 %v525_v27, %v317_v33  ;;  %v350_v56 = vmax.f32 %v338_v46, 0.0 }
  0xa4   : > { %v331_v40 = vadd.f32 %v525_v27, %v315_v36  ;;  %v348_v54 = vmax.f32 %v336_v43, 0.0 }
  0xa5   : > { %v345_v42 = vmax.f32 %v333_v38, 0.0 }
  0xa6   : > { %v302_v44 = vpop.f32.mrf.mxu3  ;;  %v343_v45 = vmax.f32 %v331_v40, 0.0 }
  0xa7   : > { %v477_v47 = vpack.c.bf16 %v345_v42, %v344_v41  ;;  %v323_v48 = vmul.f32 %v524_v23, %v302_v44  ;;  %v297_v49 = vpop.f32.mrf.mxu2 }
  0xa8   : > { %v290_v50 = vpop.f32.mrf.mxu1  ;;  %v472_v51 = vpack.c.bf16 %v343_v45, %v342_v39  ;;  %v321_v52 = vmul.f32 %v524_v23, %v297_v49 }
  0xa9   : > { %499 = vst [vmem:[%s615_s11 + $0x8] sm:$0xff] %v477_v47   ;;  %v339_v53 = vadd.f32 %v525_v27, %v323_v48  ;;  %v318_v60 = vmul.f32 %v524_v23, %v290_v50 }
  0xaa   : > { %473 = vst [vmem:[%s615_s11] sm:$0xff] %v472_v51   ;;  %v337_v55 = vadd.f32 %v525_v27, %v321_v52 }
  0xab   : > { %v351_v57 = vmax.f32 %v339_v53, 0.0  ;;  %v334_v0 = vadd.f32 %v525_v27, %v318_v60 }
  0xac   : > { %v349_v58 = vmax.f32 %v337_v55, 0.0 }
  0xad   : > { %v492_v59 = vpack.c.bf16 %v351_v57, %v350_v56  ;;  %v346_v4 = vmax.f32 %v334_v0, 0.0 }
  0xae   : > { %v487_v61 = vpack.c.bf16 %v349_v58, %v348_v54  ;;  %v305_v62 = vpop.f32.mrf.mxu3 }
  0xaf   : > { %502 = vst [vmem:[%s615_s11 + $0x20] sm:$0xff] %v492_v59   ;;  %v324_v2 = vmul.f32 %v524_v23, %v305_v62 }
  0xb0   : > { %501 = vst [vmem:[%s615_s11 + $0x18] sm:$0xff] %v487_v61   ;;  %v292_v63 = vpop.f32.mrf.mxu1 }
  0xb1   : > { %v319_v1 = vmul.f32 %v524_v23, %v292_v63  ;;  %v340_v7 = vadd.f32 %v525_v27, %v324_v2 }
  0xb3   : > { %v335_v3 = vadd.f32 %v525_v27, %v319_v1  ;;  %v352_v11 = vmax.f32 %v340_v7, 0.0 }
  0xb5   : > { %v347_v5 = vmax.f32 %v335_v3, 0.0 }
  0xb6   : > { %v307_v6 = vpop.f32.mrf.mxu3 }
  0xb7   : > { %v482_v8 = vpack.c.bf16 %v347_v5, %v346_v4  ;;  %v325_v9 = vmul.f32 %v524_v23, %v307_v6 }
  0xb9   : > { %500 = vst [vmem:[%s615_s11 + $0x10] sm:$0xff] %v482_v8   ;;  %v341_v10 = vadd.f32 %v525_v27, %v325_v9 }
  0xbb   : > { %v353_v12 = vmax.f32 %v341_v10, 0.0 }
  0xbd   : > { %v497_v13 = vpack.c.bf16 %v353_v12, %v352_v11 }
  0xbf   : > { %503 = vst [vmem:[%s615_s11 + $0x28] sm:$0xff] %v497_v13  }
  0xc0 PF: > { %s14_s15 = sadd.s32 1, %s532_s15  }
  0xc1   : > { %p11_p4 = scmp.ge.s32.totalorder %s14_s15, 4  }
  0xc3   :  { %13 = sbr.rel (!%p11_p4) target bundleno = 1 (0x1), region = 66 }

</bundles_post_ra>
